<compile_context>
chip_gen: v5e
topology: v5e:2x2
jax: 0.10.0
libtpu: 0.0.40
codegen_flags: <defaults>
</compile_context>

<pallas_src>
import functools

import jax
import jax.numpy as jnp
from jax.experimental import pallas as pl
from jax.experimental.pallas import tpu as pltpu


# ----------------------------------------------------------------------------- kernel

def _matmul_bias_act_kernel(x_ref, w_ref, b_ref, o_ref, acc_ref, *, apply_relu):
    # Grid = (M tiles, N tiles, K tiles); K is the reduction axis (last, "arbitrary").
    k = pl.program_id(2)

    @pl.when(k == 0)
    def _init():
        acc_ref[...] = jnp.zeros_like(acc_ref)

    acc_ref[...] += jnp.dot(x_ref[...], w_ref[...],
                            preferred_element_type=jnp.float32)

    @pl.when(k == pl.num_programs(2) - 1)
    def _finalize():
        y = acc_ref[...] + b_ref[...]          # bias add in f32
        if apply_relu:
            y = jnp.maximum(y, 0.0)            # ReLU in f32
        o_ref[...] = y.astype(o_ref.dtype)


def _round_up(x, m):
    return (x + m - 1) // m * m


def matmul_bias_act(x, w, b=None, *, relu=False, compute_dtype=None,
                    max_tile_m=256, max_tile_n=512, max_tile_k=512):
    """y = act(x @ w + b).  x: [M, K]; w: [K, N] (already 'in x out'); b: [N] or None.

    Pads M to a sublane multiple (8), N to a lane multiple (128, lane-dense stores) and
    K to the reduction tile; slices the [M, N] f32 result back out.
    """
    M, K = x.shape
    K2, N = w.shape
    assert K == K2, (K, K2)
    if b is None:
        b = jnp.zeros((N,), jnp.float32)
    if compute_dtype is None:
        compute_dtype = jnp.float32

    # --- tile / padding choices --------------------------------------------------
    if M <= max_tile_m:                       # single grid step over rows for small M
        tile_m = _round_up(M, 8)
        M_p = tile_m
    else:
        tile_m = max_tile_m
        M_p = _round_up(M, tile_m)

    N_p = _round_up(N, 128)                   # lane-dense output (128-aligned)
    if N_p <= max_tile_n:
        tile_n = N_p
    else:
        tile_n = max_tile_n
        N_p = _round_up(N, tile_n)

    if K <= max_tile_k:                       # whole contraction in one step
        tile_k = K
        K_p = K
    else:                                     # K-tiled reduction with accumulator
        tile_k = max_tile_k
        K_p = _round_up(K, tile_k)

    # --- zero-padded operands (zeros are inert through matmul, bias add and ReLU) -
    x_p = jnp.zeros((M_p, K_p), compute_dtype).at[:M, :K].set(x.astype(compute_dtype))
    w_p = jnp.zeros((K_p, N_p), compute_dtype).at[:K, :N].set(w.astype(compute_dtype))
    b_p = jnp.zeros((1, N_p), jnp.float32).at[0, :N].set(
        b.reshape(-1).astype(jnp.float32))

    grid = (M_p // tile_m, N_p // tile_n, K_p // tile_k)

    out = pl.pallas_call(
        functools.partial(_matmul_bias_act_kernel, apply_relu=relu),
        out_shape=jax.ShapeDtypeStruct((M_p, N_p), jnp.float32),
        grid=grid,
        in_specs=[
            pl.BlockSpec((tile_m, tile_k), lambda i, j, k: (i, k)),
            pl.BlockSpec((tile_k, tile_n), lambda i, j, k: (k, j)),
            pl.BlockSpec((1, tile_n), lambda i, j, k: (0, j)),
        ],
        out_specs=pl.BlockSpec((tile_m, tile_n), lambda i, j, k: (i, j)),
        scratch_shapes=[pltpu.VMEM((tile_m, tile_n), jnp.float32)],
        compiler_params=pltpu.CompilerParams(
            dimension_semantics=("parallel", "parallel", "arbitrary")),
    )(x_p, w_p, b_p)

    return out[:M, :N]


# ----------------------------------------------------------------------------- model

def forward_pallas(A_norm, M_mean, h, params, *, compute_dtype):
    """Classifier_v2_backup forward: 4x GraphConv+ReLU -> mean_nodes -> MLP head."""
    for w, b in params["convs"]:
        agg = matmul_bias_act(A_norm, h, None, relu=False, compute_dtype=compute_dtype)
        h = matmul_bias_act(agg, w, b, relu=True, compute_dtype=compute_dtype)
    hg = matmul_bias_act(M_mean, h, None, relu=False, compute_dtype=compute_dtype)
    w5, b5 = params["classify1"]
    w6, b6 = params["classify2"]
    out = matmul_bias_act(hg, w5, b5, relu=True, compute_dtype=compute_dtype)
    out = matmul_bias_act(out, w6, b6, relu=False, compute_dtype=compute_dtype)
    return out


def forward_ref(A_norm, M_mean, h, params):
    for w, b in params["convs"]:
        h = jnp.maximum(A_norm @ h @ w + b, 0.0)
    hg = M_mean @ h
    w5, b5 = params["classify1"]
    w6, b6 = params["classify2"]
    out = jnp.maximum(hg @ w5 + b5, 0.0)
    return out @ w6 + b6


# ------------------------------------------------------------------------------ demo

if __name__ == "__main__":
    GRAPH_SIZES = (30, 34)            # batched graph of 2 graphs, 64 nodes total
    N_NODES = sum(GRAPH_SIZES)
    IN_DIM, HIDDEN_DIM, N_CLASSES = 16, 32, 5

    key = jax.random.PRNGKey(0)
    k_adj, k_h, k_params = jax.random.split(key, 3)

    # Block-diagonal symmetric-normalized adjacency with self-loops (dense, demo scale).
    A = jnp.zeros((N_NODES, N_NODES), jnp.float32)
    off = 0
    for sz, kk in zip(GRAPH_SIZES, jax.random.split(k_adj, len(GRAPH_SIZES))):
        sub = (jax.random.uniform(kk, (sz, sz)) < 0.2).astype(jnp.float32)
        sub = jnp.maximum(sub, sub.T)
        sub = jnp.maximum(sub, jnp.eye(sz, dtype=jnp.float32))
        A = A.at[off:off + sz, off:off + sz].set(sub)
        off += sz
    d_inv_sqrt = 1.0 / jnp.sqrt(A.sum(axis=1))
    A_norm = A * d_inv_sqrt[:, None] * d_inv_sqrt[None, :]

    # mean_nodes readout matrix: [num_graphs, num_nodes].
    M_mean = jnp.zeros((len(GRAPH_SIZES), N_NODES), jnp.float32)
    off = 0
    for gi, sz in enumerate(GRAPH_SIZES):
        M_mean = M_mean.at[gi, off:off + sz].set(1.0 / sz)
        off += sz

    # Node features and synthetic parameters (weights stored [in, out]; no transpose).
    h0 = jax.random.normal(k_h, (N_NODES, IN_DIM), dtype=jnp.float32)

    def make_linear(k, fan_in, fan_out):
        kw, kb = jax.random.split(k)
        s = 1.0 / jnp.sqrt(jnp.float32(fan_in))
        w = jax.random.uniform(kw, (fan_in, fan_out), jnp.float32, -s, s)
        b = jax.random.uniform(kb, (fan_out,), jnp.float32, -s, s)
        return w, b

    pkeys = jax.random.split(k_params, 6)
    params = {
        "convs": [
            make_linear(pkeys[0], IN_DIM, HIDDEN_DIM),
            make_linear(pkeys[1], HIDDEN_DIM, HIDDEN_DIM),
            make_linear(pkeys[2], HIDDEN_DIM, HIDDEN_DIM),
            make_linear(pkeys[3], HIDDEN_DIM, HIDDEN_DIM),
        ],
        "classify1": make_linear(pkeys[4], HIDDEN_DIM, HIDDEN_DIM),
        "classify2": make_linear(pkeys[5], HIDDEN_DIM, N_CLASSES),
    }

    fwd_f32 = jax.jit(functools.partial(forward_pallas, compute_dtype=jnp.float32))
    fwd_bf16 = jax.jit(functools.partial(forward_pallas, compute_dtype=jnp.bfloat16))

    out = jax.block_until_ready(fwd_f32(A_norm, M_mean, h0, params))
    ref = forward_ref(A_norm, M_mean, h0, params)
    assert out.shape == (len(GRAPH_SIZES), N_CLASSES)
    assert jnp.allclose(out, ref, atol=1e-4, rtol=1e-4)

    # bf16-input / f32-accumulate path (v6e / v7x MXU-rate path) — loose tolerance.
    out_bf16 = jax.block_until_ready(fwd_bf16(A_norm, M_mean, h0, params))
    assert out_bf16.shape == (len(GRAPH_SIZES), N_CLASSES)
    assert bool(jnp.all(jnp.isfinite(out_bf16)))
    assert jnp.allclose(out_bf16, ref, atol=2e-1, rtol=2e-1)

    print("KERNEL_OK")
</pallas_src>

<mosaic_0001>
module attributes {stable_mosaic.version = 11 : i64} {
  func.func @_matmul_bias_act_kernel(%arg0: i32, %arg1: i32, %arg2: i32, %arg3: memref<64x64xf32, #tpu.memory_space<vmem>>, %arg4: memref<64x128xf32, #tpu.memory_space<vmem>>, %arg5: memref<1x128xf32, #tpu.memory_space<vmem>>, %arg6: memref<64x128xf32, #tpu.memory_space<vmem>>, %arg7: memref<64x128xf32, #tpu.memory_space<vmem>>) attributes {dimension_semantics = [#tpu.dimension_semantics<parallel>, #tpu.dimension_semantics<parallel>, #tpu.dimension_semantics<arbitrary>], iteration_bounds = array<i64: 1, 1, 1>, scalar_prefetch = 0 : i64, scratch_operands = 1 : i64, tpu.core_type = #tpu.core_type<tc>, window_params = [{transform_indices = @transform_0, window_bounds = array<i64: 64, 64>}, {transform_indices = @transform_1, window_bounds = array<i64: 64, 128>}, {transform_indices = @transform_2, window_bounds = array<i64: 1, 128>}, {transform_indices = @transform_3, window_bounds = array<i64: 64, 128>}]} {
    %c0_i32 = arith.constant 0 : i32
    %0 = arith.cmpi eq, %arg2, %c0_i32 : i32
    %1 = arith.extui %0 : i1 to i32
    %c0_i32_0 = arith.constant 0 : i32
    %2 = arith.cmpi ne, %1, %c0_i32_0 : i32
    scf.if %2 {
      %cst_10 = arith.constant 0.000000e+00 : f32
      %12 = vector.broadcast %cst_10 : f32 to vector<64x128xf32>
      %c0_11 = arith.constant 0 : index
      %c0_12 = arith.constant 0 : index
      %13 = vector.load %arg7[%c0_11, %c0_12] : memref<64x128xf32, #tpu.memory_space<vmem>>, vector<64x128xf32>
      tpu.vector_store %arg7[%c0_11, %c0_12], %12 {strides = array<i32>} : memref<64x128xf32, #tpu.memory_space<vmem>>, vector<64x128xf32>,
    } else {
    }
    %c0 = arith.constant 0 : index
    %c0_1 = arith.constant 0 : index
    %3 = vector.load %arg7[%c0, %c0_1] : memref<64x128xf32, #tpu.memory_space<vmem>>, vector<64x128xf32>
    %c0_2 = arith.constant 0 : index
    %c0_3 = arith.constant 0 : index
    %4 = vector.load %arg3[%c0_2, %c0_3] : memref<64x64xf32, #tpu.memory_space<vmem>>, vector<64x64xf32>
    %c0_4 = arith.constant 0 : index
    %c0_5 = arith.constant 0 : index
    %5 = vector.load %arg4[%c0_4, %c0_5] : memref<64x128xf32, #tpu.memory_space<vmem>>, vector<64x128xf32>
    %cst = arith.constant dense<0.000000e+00> : vector<64x128xf32>
    %6 = tpu.matmul %4, %5, %cst {dimension_numbers = #tpu.dot_dimension_numbers<[1], [0], [0], [1], [0, 0, 1, 1], [], []>} : vector<64x64xf32>, vector<64x128xf32>, vector<64x128xf32> -> vector<64x128xf32>
    %7 = arith.addf %3, %6 : vector<64x128xf32>
    %c0_6 = arith.constant 0 : index
    %c0_7 = arith.constant 0 : index
    %8 = vector.load %arg7[%c0_6, %c0_7] : memref<64x128xf32, #tpu.memory_space<vmem>>, vector<64x128xf32>
    tpu.vector_store %arg7[%c0_6, %c0_7], %7 {strides = array<i32>} : memref<64x128xf32, #tpu.memory_space<vmem>>, vector<64x128xf32>,
    %c0_i32_8 = arith.constant 0 : i32
    %9 = arith.cmpi eq, %arg2, %c0_i32_8 : i32
    %10 = arith.extui %9 : i1 to i32
    %c0_i32_9 = arith.constant 0 : i32
    %11 = arith.cmpi ne, %10, %c0_i32_9 : i32
    scf.if %11 {
      %c0_10 = arith.constant 0 : index
      %c0_11 = arith.constant 0 : index
      %12 = vector.load %arg7[%c0_10, %c0_11] : memref<64x128xf32, #tpu.memory_space<vmem>>, vector<64x128xf32>
      %c0_12 = arith.constant 0 : index
      %c0_13 = arith.constant 0 : index
      %13 = vector.load %arg5[%c0_12, %c0_13] : memref<1x128xf32, #tpu.memory_space<vmem>>, vector<1x128xf32>
      %14 = vector.broadcast %13 : vector<1x128xf32> to vector<64x128xf32>
      %15 = arith.addf %12, %14 : vector<64x128xf32>
      %c0_14 = arith.constant 0 : index
      %c0_15 = arith.constant 0 : index
      %16 = vector.load %arg6[%c0_14, %c0_15] : memref<64x128xf32, #tpu.memory_space<vmem>>, vector<64x128xf32>
      tpu.vector_store %arg6[%c0_14, %c0_15], %15 {strides = array<i32>} : memref<64x128xf32, #tpu.memory_space<vmem>>, vector<64x128xf32>,
    } else {
    }
    return
  }
  func.func @transform_0(%arg0: i32, %arg1: i32, %arg2: i32) -> (i32, i32) {
    %c0_i32 = arith.constant 0 : i32
    return %arg0, %arg2 : i32, i32
  }
  func.func @transform_1(%arg0: i32, %arg1: i32, %arg2: i32) -> (i32, i32) {
    %c0_i32 = arith.constant 0 : i32
    return %arg2, %arg1 : i32, i32
  }
  func.func @transform_2(%arg0: i32, %arg1: i32, %arg2: i32) -> (i32, i32) {
    %c0_i32 = arith.constant 0 : i32
    %c0_i32_0 = arith.constant 0 : i32
    return %c0_i32, %arg1 : i32, i32
  }
  func.func @transform_3(%arg0: i32, %arg1: i32, %arg2: i32) -> (i32, i32) {
    %c0_i32 = arith.constant 0 : i32
    return %arg0, %arg1 : i32, i32
  }
}

module attributes {stable_mosaic.version = 11 : i64} {
  func.func @_matmul_bias_act_kernel(%arg0: i32, %arg1: i32, %arg2: i32, %arg3: memref<64x16xf32, #tpu.memory_space<vmem>>, %arg4: memref<16x128xf32, #tpu.memory_space<vmem>>, %arg5: memref<1x128xf32, #tpu.memory_space<vmem>>, %arg6: memref<64x128xf32, #tpu.memory_space<vmem>>, %arg7: memref<64x128xf32, #tpu.memory_space<vmem>>) attributes {dimension_semantics = [#tpu.dimension_semantics<parallel>, #tpu.dimension_semantics<parallel>, #tpu.dimension_semantics<arbitrary>], iteration_bounds = array<i64: 1, 1, 1>, scalar_prefetch = 0 : i64, scratch_operands = 1 : i64, tpu.core_type = #tpu.core_type<tc>, window_params = [{transform_indices = @transform_0, window_bounds = array<i64: 64, 16>}, {transform_indices = @transform_1, window_bounds = array<i64: 16, 128>}, {transform_indices = @transform_2, window_bounds = array<i64: 1, 128>}, {transform_indices = @transform_3, window_bounds = array<i64: 64, 128>}]} {
    %c0_i32 = arith.constant 0 : i32
    %0 = arith.cmpi eq, %arg2, %c0_i32 : i32
    %1 = arith.extui %0 : i1 to i32
    %c0_i32_0 = arith.constant 0 : i32
    %2 = arith.cmpi ne, %1, %c0_i32_0 : i32
    scf.if %2 {
      %cst_10 = arith.constant 0.000000e+00 : f32
      %12 = vector.broadcast %cst_10 : f32 to vector<64x128xf32>
      %c0_11 = arith.constant 0 : index
      %c0_12 = arith.constant 0 : index
      %13 = vector.load %arg7[%c0_11, %c0_12] : memref<64x128xf32, #tpu.memory_space<vmem>>, vector<64x128xf32>
      tpu.vector_store %arg7[%c0_11, %c0_12], %12 {strides = array<i32>} : memref<64x128xf32, #tpu.memory_space<vmem>>, vector<64x128xf32>,
    } else {
    }
    %c0 = arith.constant 0 : index
    %c0_1 = arith.constant 0 : index
    %3 = vector.load %arg7[%c0, %c0_1] : memref<64x128xf32, #tpu.memory_space<vmem>>, vector<64x128xf32>
    %c0_2 = arith.constant 0 : index
    %c0_3 = arith.constant 0 : index
    %4 = vector.load %arg3[%c0_2, %c0_3] : memref<64x16xf32, #tpu.memory_space<vmem>>, vector<64x16xf32>
    %c0_4 = arith.constant 0 : index
    %c0_5 = arith.constant 0 : index
    %5 = vector.load %arg4[%c0_4, %c0_5] : memref<16x128xf32, #tpu.memory_space<vmem>>, vector<16x128xf32>
    %cst = arith.constant dense<0.000000e+00> : vector<64x128xf32>
    %6 = tpu.matmul %4, %5, %cst {dimension_numbers = #tpu.dot_dimension_numbers<[1], [0], [0], [1], [0, 0, 1, 1], [], []>} : vector<64x16xf32>, vector<16x128xf32>, vector<64x128xf32> -> vector<64x128xf32>
    %7 = arith.addf %3, %6 : vector<64x128xf32>
    %c0_6 = arith.constant 0 : index
    %c0_7 = arith.constant 0 : index
    %8 = vector.load %arg7[%c0_6, %c0_7] : memref<64x128xf32, #tpu.memory_space<vmem>>, vector<64x128xf32>
    tpu.vector_store %arg7[%c0_6, %c0_7], %7 {strides = array<i32>} : memref<64x128xf32, #tpu.memory_space<vmem>>, vector<64x128xf32>,
    %c0_i32_8 = arith.constant 0 : i32
    %9 = arith.cmpi eq, %arg2, %c0_i32_8 : i32
    %10 = arith.extui %9 : i1 to i32
    %c0_i32_9 = arith.constant 0 : i32
    %11 = arith.cmpi ne, %10, %c0_i32_9 : i32
    scf.if %11 {
      %c0_10 = arith.constant 0 : index
      %c0_11 = arith.constant 0 : index
      %12 = vector.load %arg7[%c0_10, %c0_11] : memref<64x128xf32, #tpu.memory_space<vmem>>, vector<64x128xf32>
      %c0_12 = arith.constant 0 : index
      %c0_13 = arith.constant 0 : index
      %13 = vector.load %arg5[%c0_12, %c0_13] : memref<1x128xf32, #tpu.memory_space<vmem>>, vector<1x128xf32>
      %14 = vector.broadcast %13 : vector<1x128xf32> to vector<64x128xf32>
      %15 = arith.addf %12, %14 : vector<64x128xf32>
      %cst_14 = arith.constant 0.000000e+00 : f32
      %16 = vector.broadcast %cst_14 : f32 to vector<64x128xf32>
      %17 = arith.maximumf %15, %16 : vector<64x128xf32>
      %c0_15 = arith.constant 0 : index
      %c0_16 = arith.constant 0 : index
      %18 = vector.load %arg6[%c0_15, %c0_16] : memref<64x128xf32, #tpu.memory_space<vmem>>, vector<64x128xf32>
      tpu.vector_store %arg6[%c0_15, %c0_16], %17 {strides = array<i32>} : memref<64x128xf32, #tpu.memory_space<vmem>>, vector<64x128xf32>,
    } else {
    }
    return
  }
  func.func @transform_0(%arg0: i32, %arg1: i32, %arg2: i32) -> (i32, i32) {
    %c0_i32 = arith.constant 0 : i32
    return %arg0, %arg2 : i32, i32
  }
  func.func @transform_1(%arg0: i32, %arg1: i32, %arg2: i32) -> (i32, i32) {
    %c0_i32 = arith.constant 0 : i32
    return %arg2, %arg1 : i32, i32
  }
  func.func @transform_2(%arg0: i32, %arg1: i32, %arg2: i32) -> (i32, i32) {
    %c0_i32 = arith.constant 0 : i32
    %c0_i32_0 = arith.constant 0 : i32
    return %c0_i32, %arg1 : i32, i32
  }
  func.func @transform_3(%arg0: i32, %arg1: i32, %arg2: i32) -> (i32, i32) {
    %c0_i32 = arith.constant 0 : i32
    return %arg0, %arg1 : i32, i32
  }
}

module attributes {stable_mosaic.version = 11 : i64} {
  func.func @_matmul_bias_act_kernel(%arg0: i32, %arg1: i32, %arg2: i32, %arg3: memref<64x32xf32, #tpu.memory_space<vmem>>, %arg4: memref<32x128xf32, #tpu.memory_space<vmem>>, %arg5: memref<1x128xf32, #tpu.memory_space<vmem>>, %arg6: memref<64x128xf32, #tpu.memory_space<vmem>>, %arg7: memref<64x128xf32, #tpu.memory_space<vmem>>) attributes {dimension_semantics = [#tpu.dimension_semantics<parallel>, #tpu.dimension_semantics<parallel>, #tpu.dimension_semantics<arbitrary>], iteration_bounds = array<i64: 1, 1, 1>, scalar_prefetch = 0 : i64, scratch_operands = 1 : i64, tpu.core_type = #tpu.core_type<tc>, window_params = [{transform_indices = @transform_0, window_bounds = array<i64: 64, 32>}, {transform_indices = @transform_1, window_bounds = array<i64: 32, 128>}, {transform_indices = @transform_2, window_bounds = array<i64: 1, 128>}, {transform_indices = @transform_3, window_bounds = array<i64: 64, 128>}]} {
    %c0_i32 = arith.constant 0 : i32
    %0 = arith.cmpi eq, %arg2, %c0_i32 : i32
    %1 = arith.extui %0 : i1 to i32
    %c0_i32_0 = arith.constant 0 : i32
    %2 = arith.cmpi ne, %1, %c0_i32_0 : i32
    scf.if %2 {
      %cst_10 = arith.constant 0.000000e+00 : f32
      %12 = vector.broadcast %cst_10 : f32 to vector<64x128xf32>
      %c0_11 = arith.constant 0 : index
      %c0_12 = arith.constant 0 : index
      %13 = vector.load %arg7[%c0_11, %c0_12] : memref<64x128xf32, #tpu.memory_space<vmem>>, vector<64x128xf32>
      tpu.vector_store %arg7[%c0_11, %c0_12], %12 {strides = array<i32>} : memref<64x128xf32, #tpu.memory_space<vmem>>, vector<64x128xf32>,
    } else {
    }
    %c0 = arith.constant 0 : index
    %c0_1 = arith.constant 0 : index
    %3 = vector.load %arg7[%c0, %c0_1] : memref<64x128xf32, #tpu.memory_space<vmem>>, vector<64x128xf32>
    %c0_2 = arith.constant 0 : index
    %c0_3 = arith.constant 0 : index
    %4 = vector.load %arg3[%c0_2, %c0_3] : memref<64x32xf32, #tpu.memory_space<vmem>>, vector<64x32xf32>
    %c0_4 = arith.constant 0 : index
    %c0_5 = arith.constant 0 : index
    %5 = vector.load %arg4[%c0_4, %c0_5] : memref<32x128xf32, #tpu.memory_space<vmem>>, vector<32x128xf32>
    %cst = arith.constant dense<0.000000e+00> : vector<64x128xf32>
    %6 = tpu.matmul %4, %5, %cst {dimension_numbers = #tpu.dot_dimension_numbers<[1], [0], [0], [1], [0, 0, 1, 1], [], []>} : vector<64x32xf32>, vector<32x128xf32>, vector<64x128xf32> -> vector<64x128xf32>
    %7 = arith.addf %3, %6 : vector<64x128xf32>
    %c0_6 = arith.constant 0 : index
    %c0_7 = arith.constant 0 : index
    %8 = vector.load %arg7[%c0_6, %c0_7] : memref<64x128xf32, #tpu.memory_space<vmem>>, vector<64x128xf32>
    tpu.vector_store %arg7[%c0_6, %c0_7], %7 {strides = array<i32>} : memref<64x128xf32, #tpu.memory_space<vmem>>, vector<64x128xf32>,
    %c0_i32_8 = arith.constant 0 : i32
    %9 = arith.cmpi eq, %arg2, %c0_i32_8 : i32
    %10 = arith.extui %9 : i1 to i32
    %c0_i32_9 = arith.constant 0 : i32
    %11 = arith.cmpi ne, %10, %c0_i32_9 : i32
    scf.if %11 {
      %c0_10 = arith.constant 0 : index
      %c0_11 = arith.constant 0 : index
      %12 = vector.load %arg7[%c0_10, %c0_11] : memref<64x128xf32, #tpu.memory_space<vmem>>, vector<64x128xf32>
      %c0_12 = arith.constant 0 : index
      %c0_13 = arith.constant 0 : index
      %13 = vector.load %arg5[%c0_12, %c0_13] : memref<1x128xf32, #tpu.memory_space<vmem>>, vector<1x128xf32>
      %14 = vector.broadcast %13 : vector<1x128xf32> to vector<64x128xf32>
      %15 = arith.addf %12, %14 : vector<64x128xf32>
      %cst_14 = arith.constant 0.000000e+00 : f32
      %16 = vector.broadcast %cst_14 : f32 to vector<64x128xf32>
      %17 = arith.maximumf %15, %16 : vector<64x128xf32>
      %c0_15 = arith.constant 0 : index
      %c0_16 = arith.constant 0 : index
      %18 = vector.load %arg6[%c0_15, %c0_16] : memref<64x128xf32, #tpu.memory_space<vmem>>, vector<64x128xf32>
      tpu.vector_store %arg6[%c0_15, %c0_16], %17 {strides = array<i32>} : memref<64x128xf32, #tpu.memory_space<vmem>>, vector<64x128xf32>,
    } else {
    }
    return
  }
  func.func @transform_0(%arg0: i32, %arg1: i32, %arg2: i32) -> (i32, i32) {
    %c0_i32 = arith.constant 0 : i32
    return %arg0, %arg2 : i32, i32
  }
  func.func @transform_1(%arg0: i32, %arg1: i32, %arg2: i32) -> (i32, i32) {
    %c0_i32 = arith.constant 0 : i32
    return %arg2, %arg1 : i32, i32
  }
  func.func @transform_2(%arg0: i32, %arg1: i32, %arg2: i32) -> (i32, i32) {
    %c0_i32 = arith.constant 0 : i32
    %c0_i32_0 = arith.constant 0 : i32
    return %c0_i32, %arg1 : i32, i32
  }
  func.func @transform_3(%arg0: i32, %arg1: i32, %arg2: i32) -> (i32, i32) {
    %c0_i32 = arith.constant 0 : i32
    return %arg0, %arg1 : i32, i32
  }
}

module attributes {stable_mosaic.version = 11 : i64} {
  func.func @_matmul_bias_act_kernel(%arg0: i32, %arg1: i32, %arg2: i32, %arg3: memref<8x64xf32, #tpu.memory_space<vmem>>, %arg4: memref<64x128xf32, #tpu.memory_space<vmem>>, %arg5: memref<1x128xf32, #tpu.memory_space<vmem>>, %arg6: memref<8x128xf32, #tpu.memory_space<vmem>>, %arg7: memref<8x128xf32, #tpu.memory_space<vmem>>) attributes {dimension_semantics = [#tpu.dimension_semantics<parallel>, #tpu.dimension_semantics<parallel>, #tpu.dimension_semantics<arbitrary>], iteration_bounds = array<i64: 1, 1, 1>, scalar_prefetch = 0 : i64, scratch_operands = 1 : i64, tpu.core_type = #tpu.core_type<tc>, window_params = [{transform_indices = @transform_0, window_bounds = array<i64: 8, 64>}, {transform_indices = @transform_1, window_bounds = array<i64: 64, 128>}, {transform_indices = @transform_2, window_bounds = array<i64: 1, 128>}, {transform_indices = @transform_3, window_bounds = array<i64: 8, 128>}]} {
    %c0_i32 = arith.constant 0 : i32
    %0 = arith.cmpi eq, %arg2, %c0_i32 : i32
    %1 = arith.extui %0 : i1 to i32
    %c0_i32_0 = arith.constant 0 : i32
    %2 = arith.cmpi ne, %1, %c0_i32_0 : i32
    scf.if %2 {
      %cst_10 = arith.constant 0.000000e+00 : f32
      %12 = vector.broadcast %cst_10 : f32 to vector<8x128xf32>
      %c0_11 = arith.constant 0 : index
      %c0_12 = arith.constant 0 : index
      %13 = vector.load %arg7[%c0_11, %c0_12] : memref<8x128xf32, #tpu.memory_space<vmem>>, vector<8x128xf32>
      tpu.vector_store %arg7[%c0_11, %c0_12], %12 {strides = array<i32>} : memref<8x128xf32, #tpu.memory_space<vmem>>, vector<8x128xf32>,
    } else {
    }
    %c0 = arith.constant 0 : index
    %c0_1 = arith.constant 0 : index
    %3 = vector.load %arg7[%c0, %c0_1] : memref<8x128xf32, #tpu.memory_space<vmem>>, vector<8x128xf32>
    %c0_2 = arith.constant 0 : index
    %c0_3 = arith.constant 0 : index
    %4 = vector.load %arg3[%c0_2, %c0_3] : memref<8x64xf32, #tpu.memory_space<vmem>>, vector<8x64xf32>
    %c0_4 = arith.constant 0 : index
    %c0_5 = arith.constant 0 : index
    %5 = vector.load %arg4[%c0_4, %c0_5] : memref<64x128xf32, #tpu.memory_space<vmem>>, vector<64x128xf32>
    %cst = arith.constant dense<0.000000e+00> : vector<8x128xf32>
    %6 = tpu.matmul %4, %5, %cst {dimension_numbers = #tpu.dot_dimension_numbers<[1], [0], [0], [1], [0, 0, 1, 1], [], []>} : vector<8x64xf32>, vector<64x128xf32>, vector<8x128xf32> -> vector<8x128xf32>
    %7 = arith.addf %3, %6 : vector<8x128xf32>
    %c0_6 = arith.constant 0 : index
    %c0_7 = arith.constant 0 : index
    %8 = vector.load %arg7[%c0_6, %c0_7] : memref<8x128xf32, #tpu.memory_space<vmem>>, vector<8x128xf32>
    tpu.vector_store %arg7[%c0_6, %c0_7], %7 {strides = array<i32>} : memref<8x128xf32, #tpu.memory_space<vmem>>, vector<8x128xf32>,
    %c0_i32_8 = arith.constant 0 : i32
    %9 = arith.cmpi eq, %arg2, %c0_i32_8 : i32
    %10 = arith.extui %9 : i1 to i32
    %c0_i32_9 = arith.constant 0 : i32
    %11 = arith.cmpi ne, %10, %c0_i32_9 : i32
    scf.if %11 {
      %c0_10 = arith.constant 0 : index
      %c0_11 = arith.constant 0 : index
      %12 = vector.load %arg7[%c0_10, %c0_11] : memref<8x128xf32, #tpu.memory_space<vmem>>, vector<8x128xf32>
      %c0_12 = arith.constant 0 : index
      %c0_13 = arith.constant 0 : index
      %13 = vector.load %arg5[%c0_12, %c0_13] : memref<1x128xf32, #tpu.memory_space<vmem>>, vector<1x128xf32>
      %14 = vector.broadcast %13 : vector<1x128xf32> to vector<8x128xf32>
      %15 = arith.addf %12, %14 : vector<8x128xf32>
      %c0_14 = arith.constant 0 : index
      %c0_15 = arith.constant 0 : index
      %16 = vector.load %arg6[%c0_14, %c0_15] : memref<8x128xf32, #tpu.memory_space<vmem>>, vector<8x128xf32>
      tpu.vector_store %arg6[%c0_14, %c0_15], %15 {strides = array<i32>} : memref<8x128xf32, #tpu.memory_space<vmem>>, vector<8x128xf32>,
    } else {
    }
    return
  }
  func.func @transform_0(%arg0: i32, %arg1: i32, %arg2: i32) -> (i32, i32) {
    %c0_i32 = arith.constant 0 : i32
    return %arg0, %arg2 : i32, i32
  }
  func.func @transform_1(%arg0: i32, %arg1: i32, %arg2: i32) -> (i32, i32) {
    %c0_i32 = arith.constant 0 : i32
    return %arg2, %arg1 : i32, i32
  }
  func.func @transform_2(%arg0: i32, %arg1: i32, %arg2: i32) -> (i32, i32) {
    %c0_i32 = arith.constant 0 : i32
    %c0_i32_0 = arith.constant 0 : i32
    return %c0_i32, %arg1 : i32, i32
  }
  func.func @transform_3(%arg0: i32, %arg1: i32, %arg2: i32) -> (i32, i32) {
    %c0_i32 = arith.constant 0 : i32
    return %arg0, %arg1 : i32, i32
  }
}

module attributes {stable_mosaic.version = 11 : i64} {
  func.func @_matmul_bias_act_kernel(%arg0: i32, %arg1: i32, %arg2: i32, %arg3: memref<8x32xf32, #tpu.memory_space<vmem>>, %arg4: memref<32x128xf32, #tpu.memory_space<vmem>>, %arg5: memref<1x128xf32, #tpu.memory_space<vmem>>, %arg6: memref<8x128xf32, #tpu.memory_space<vmem>>, %arg7: memref<8x128xf32, #tpu.memory_space<vmem>>) attributes {dimension_semantics = [#tpu.dimension_semantics<parallel>, #tpu.dimension_semantics<parallel>, #tpu.dimension_semantics<arbitrary>], iteration_bounds = array<i64: 1, 1, 1>, scalar_prefetch = 0 : i64, scratch_operands = 1 : i64, tpu.core_type = #tpu.core_type<tc>, window_params = [{transform_indices = @transform_0, window_bounds = array<i64: 8, 32>}, {transform_indices = @transform_1, window_bounds = array<i64: 32, 128>}, {transform_indices = @transform_2, window_bounds = array<i64: 1, 128>}, {transform_indices = @transform_3, window_bounds = array<i64: 8, 128>}]} {
    %c0_i32 = arith.constant 0 : i32
    %0 = arith.cmpi eq, %arg2, %c0_i32 : i32
    %1 = arith.extui %0 : i1 to i32
    %c0_i32_0 = arith.constant 0 : i32
    %2 = arith.cmpi ne, %1, %c0_i32_0 : i32
    scf.if %2 {
      %cst_10 = arith.constant 0.000000e+00 : f32
      %12 = vector.broadcast %cst_10 : f32 to vector<8x128xf32>
      %c0_11 = arith.constant 0 : index
      %c0_12 = arith.constant 0 : index
      %13 = vector.load %arg7[%c0_11, %c0_12] : memref<8x128xf32, #tpu.memory_space<vmem>>, vector<8x128xf32>
      tpu.vector_store %arg7[%c0_11, %c0_12], %12 {strides = array<i32>} : memref<8x128xf32, #tpu.memory_space<vmem>>, vector<8x128xf32>,
    } else {
    }
    %c0 = arith.constant 0 : index
    %c0_1 = arith.constant 0 : index
    %3 = vector.load %arg7[%c0, %c0_1] : memref<8x128xf32, #tpu.memory_space<vmem>>, vector<8x128xf32>
    %c0_2 = arith.constant 0 : index
    %c0_3 = arith.constant 0 : index
    %4 = vector.load %arg3[%c0_2, %c0_3] : memref<8x32xf32, #tpu.memory_space<vmem>>, vector<8x32xf32>
    %c0_4 = arith.constant 0 : index
    %c0_5 = arith.constant 0 : index
    %5 = vector.load %arg4[%c0_4, %c0_5] : memref<32x128xf32, #tpu.memory_space<vmem>>, vector<32x128xf32>
    %cst = arith.constant dense<0.000000e+00> : vector<8x128xf32>
    %6 = tpu.matmul %4, %5, %cst {dimension_numbers = #tpu.dot_dimension_numbers<[1], [0], [0], [1], [0, 0, 1, 1], [], []>} : vector<8x32xf32>, vector<32x128xf32>, vector<8x128xf32> -> vector<8x128xf32>
    %7 = arith.addf %3, %6 : vector<8x128xf32>
    %c0_6 = arith.constant 0 : index
    %c0_7 = arith.constant 0 : index
    %8 = vector.load %arg7[%c0_6, %c0_7] : memref<8x128xf32, #tpu.memory_space<vmem>>, vector<8x128xf32>
    tpu.vector_store %arg7[%c0_6, %c0_7], %7 {strides = array<i32>} : memref<8x128xf32, #tpu.memory_space<vmem>>, vector<8x128xf32>,
    %c0_i32_8 = arith.constant 0 : i32
    %9 = arith.cmpi eq, %arg2, %c0_i32_8 : i32
    %10 = arith.extui %9 : i1 to i32
    %c0_i32_9 = arith.constant 0 : i32
    %11 = arith.cmpi ne, %10, %c0_i32_9 : i32
    scf.if %11 {
      %c0_10 = arith.constant 0 : index
      %c0_11 = arith.constant 0 : index
      %12 = vector.load %arg7[%c0_10, %c0_11] : memref<8x128xf32, #tpu.memory_space<vmem>>, vector<8x128xf32>
      %c0_12 = arith.constant 0 : index
      %c0_13 = arith.constant 0 : index
      %13 = vector.load %arg5[%c0_12, %c0_13] : memref<1x128xf32, #tpu.memory_space<vmem>>, vector<1x128xf32>
      %14 = vector.broadcast %13 : vector<1x128xf32> to vector<8x128xf32>
      %15 = arith.addf %12, %14 : vector<8x128xf32>
      %cst_14 = arith.constant 0.000000e+00 : f32
      %16 = vector.broadcast %cst_14 : f32 to vector<8x128xf32>
      %17 = arith.maximumf %15, %16 : vector<8x128xf32>
      %c0_15 = arith.constant 0 : index
      %c0_16 = arith.constant 0 : index
      %18 = vector.load %arg6[%c0_15, %c0_16] : memref<8x128xf32, #tpu.memory_space<vmem>>, vector<8x128xf32>
      tpu.vector_store %arg6[%c0_15, %c0_16], %17 {strides = array<i32>} : memref<8x128xf32, #tpu.memory_space<vmem>>, vector<8x128xf32>,
    } else {
    }
    return
  }
  func.func @transform_0(%arg0: i32, %arg1: i32, %arg2: i32) -> (i32, i32) {
    %c0_i32 = arith.constant 0 : i32
    return %arg0, %arg2 : i32, i32
  }
  func.func @transform_1(%arg0: i32, %arg1: i32, %arg2: i32) -> (i32, i32) {
    %c0_i32 = arith.constant 0 : i32
    return %arg2, %arg1 : i32, i32
  }
  func.func @transform_2(%arg0: i32, %arg1: i32, %arg2: i32) -> (i32, i32) {
    %c0_i32 = arith.constant 0 : i32
    %c0_i32_0 = arith.constant 0 : i32
    return %c0_i32, %arg1 : i32, i32
  }
  func.func @transform_3(%arg0: i32, %arg1: i32, %arg2: i32) -> (i32, i32) {
    %c0_i32 = arith.constant 0 : i32
    return %arg0, %arg1 : i32, i32
  }
}

module attributes {stable_mosaic.version = 11 : i64} {
  func.func @_matmul_bias_act_kernel(%arg0: i32, %arg1: i32, %arg2: i32, %arg3: memref<8x32xf32, #tpu.memory_space<vmem>>, %arg4: memref<32x128xf32, #tpu.memory_space<vmem>>, %arg5: memref<1x128xf32, #tpu.memory_space<vmem>>, %arg6: memref<8x128xf32, #tpu.memory_space<vmem>>, %arg7: memref<8x128xf32, #tpu.memory_space<vmem>>) attributes {dimension_semantics = [#tpu.dimension_semantics<parallel>, #tpu.dimension_semantics<parallel>, #tpu.dimension_semantics<arbitrary>], iteration_bounds = array<i64: 1, 1, 1>, scalar_prefetch = 0 : i64, scratch_operands = 1 : i64, tpu.core_type = #tpu.core_type<tc>, window_params = [{transform_indices = @transform_0, window_bounds = array<i64: 8, 32>}, {transform_indices = @transform_1, window_bounds = array<i64: 32, 128>}, {transform_indices = @transform_2, window_bounds = array<i64: 1, 128>}, {transform_indices = @transform_3, window_bounds = array<i64: 8, 128>}]} {
    %c0_i32 = arith.constant 0 : i32
    %0 = arith.cmpi eq, %arg2, %c0_i32 : i32
    %1 = arith.extui %0 : i1 to i32
    %c0_i32_0 = arith.constant 0 : i32
    %2 = arith.cmpi ne, %1, %c0_i32_0 : i32
    scf.if %2 {
      %cst_10 = arith.constant 0.000000e+00 : f32
      %12 = vector.broadcast %cst_10 : f32 to vector<8x128xf32>
      %c0_11 = arith.constant 0 : index
      %c0_12 = arith.constant 0 : index
      %13 = vector.load %arg7[%c0_11, %c0_12] : memref<8x128xf32, #tpu.memory_space<vmem>>, vector<8x128xf32>
      tpu.vector_store %arg7[%c0_11, %c0_12], %12 {strides = array<i32>} : memref<8x128xf32, #tpu.memory_space<vmem>>, vector<8x128xf32>,
    } else {
    }
    %c0 = arith.constant 0 : index
    %c0_1 = arith.constant 0 : index
    %3 = vector.load %arg7[%c0, %c0_1] : memref<8x128xf32, #tpu.memory_space<vmem>>, vector<8x128xf32>
    %c0_2 = arith.constant 0 : index
    %c0_3 = arith.constant 0 : index
    %4 = vector.load %arg3[%c0_2, %c0_3] : memref<8x32xf32, #tpu.memory_space<vmem>>, vector<8x32xf32>
    %c0_4 = arith.constant 0 : index
    %c0_5 = arith.constant 0 : index
    %5 = vector.load %arg4[%c0_4, %c0_5] : memref<32x128xf32, #tpu.memory_space<vmem>>, vector<32x128xf32>
    %cst = arith.constant dense<0.000000e+00> : vector<8x128xf32>
    %6 = tpu.matmul %4, %5, %cst {dimension_numbers = #tpu.dot_dimension_numbers<[1], [0], [0], [1], [0, 0, 1, 1], [], []>} : vector<8x32xf32>, vector<32x128xf32>, vector<8x128xf32> -> vector<8x128xf32>
    %7 = arith.addf %3, %6 : vector<8x128xf32>
    %c0_6 = arith.constant 0 : index
    %c0_7 = arith.constant 0 : index
    %8 = vector.load %arg7[%c0_6, %c0_7] : memref<8x128xf32, #tpu.memory_space<vmem>>, vector<8x128xf32>
    tpu.vector_store %arg7[%c0_6, %c0_7], %7 {strides = array<i32>} : memref<8x128xf32, #tpu.memory_space<vmem>>, vector<8x128xf32>,
    %c0_i32_8 = arith.constant 0 : i32
    %9 = arith.cmpi eq, %arg2, %c0_i32_8 : i32
    %10 = arith.extui %9 : i1 to i32
    %c0_i32_9 = arith.constant 0 : i32
    %11 = arith.cmpi ne, %10, %c0_i32_9 : i32
    scf.if %11 {
      %c0_10 = arith.constant 0 : index
      %c0_11 = arith.constant 0 : index
      %12 = vector.load %arg7[%c0_10, %c0_11] : memref<8x128xf32, #tpu.memory_space<vmem>>, vector<8x128xf32>
      %c0_12 = arith.constant 0 : index
      %c0_13 = arith.constant 0 : index
      %13 = vector.load %arg5[%c0_12, %c0_13] : memref<1x128xf32, #tpu.memory_space<vmem>>, vector<1x128xf32>
      %14 = vector.broadcast %13 : vector<1x128xf32> to vector<8x128xf32>
      %15 = arith.addf %12, %14 : vector<8x128xf32>
      %c0_14 = arith.constant 0 : index
      %c0_15 = arith.constant 0 : index
      %16 = vector.load %arg6[%c0_14, %c0_15] : memref<8x128xf32, #tpu.memory_space<vmem>>, vector<8x128xf32>
      tpu.vector_store %arg6[%c0_14, %c0_15], %15 {strides = array<i32>} : memref<8x128xf32, #tpu.memory_space<vmem>>, vector<8x128xf32>,
    } else {
    }
    return
  }
  func.func @transform_0(%arg0: i32, %arg1: i32, %arg2: i32) -> (i32, i32) {
    %c0_i32 = arith.constant 0 : i32
    return %arg0, %arg2 : i32, i32
  }
  func.func @transform_1(%arg0: i32, %arg1: i32, %arg2: i32) -> (i32, i32) {
    %c0_i32 = arith.constant 0 : i32
    return %arg2, %arg1 : i32, i32
  }
  func.func @transform_2(%arg0: i32, %arg1: i32, %arg2: i32) -> (i32, i32) {
    %c0_i32 = arith.constant 0 : i32
    %c0_i32_0 = arith.constant 0 : i32
    return %c0_i32, %arg1 : i32, i32
  }
  func.func @transform_3(%arg0: i32, %arg1: i32, %arg2: i32) -> (i32, i32) {
    %c0_i32 = arith.constant 0 : i32
    return %arg0, %arg1 : i32, i32
  }
}

</mosaic_0001>

<bundles_post_ra>
// kernel: forward_pallas.12
= control target key start
LH: loop header
LB: loop body
LE: loop exit
PB: predicated region body
PF: predicated region fallthrough
CT: control target
= control target key end

     0   :  { %vm44_vm0 = vcmask 130048   ;;  %s269_s1 = inlined_call_operand.vmem [shape: f32[16,128], index: 1, kind: input, shape index: {}]   ;;  %s270_s0 = inlined_call_operand.vmem [shape: f32[64,16], index: 0, kind: input, shape index: {}]   ;;  %s271_s2 = inlined_call_operand.vmem [shape: f32[1,128], index: 2, kind: input, shape index: {}]   ;;  %s272_s3 = inlined_call_operand.vmem [shape: f32[64,128], index: 3, kind: output, shape index: {}]  }
   0x1   :  { %v43_v0 = vld [vmem:[%s269_s1 + $0x8] sm:$0xff]  ;;  %v42_v1 = vld [vmem:[%s269_s1] sm:$0xff]  ;;  %v40_v3 = vld [vmem:[%s270_s0 + $0x30] sm:$0xff] }
   0x2   :  { %178 = vmatpush.msra.mxu2 %v43_v0  ;;  %179 = vmatpush.msra.mxu3 %v43_v0  ;;  %v38_v2 = vld [vmem:[%s270_s0 + $0x20] sm:$0xff]  ;;  %v36_v5 = vld [vmem:[%s270_s0 + $0x10] sm:$0xff]  ;;  %v39_v6 = vld [vmem:[%s270_s0 + $0x28] sm:$0xff] }
   0x3   :  { %83 = vmatpush.msra.mxu0 %v43_v0  ;;  %177 = vmatpush.msra.mxu1 %v43_v0  ;;  %v34_v4 = vld [vmem:[%s270_s0] sm:$0xff]  ;;  %v41_v7 = vld [vmem:[%s270_s0 + $0x38] sm:$0xff]  ;;  %v35_v8 = vld [vmem:[%s270_s0 + $0x8] sm:$0xff] }
   0x4   :  { %181 = vmatpush.msra.mxu2 %v42_v1  ;;  %182 = vmatpush.msra.mxu3 %v42_v1  ;;  %v37_v9 = vld [vmem:[%s270_s0 + $0x18] sm:$0xff]  ;;  %v183_v10 = vld [vmem:[%s271_s2] ss:$0 sm:$0xff] }
   0x5   :  { %173 = vmatmul.msk.f32.vlgmr.msra.gmra.mxu2 %vm44_vm0, %v38_v2  ;;  %175 = vmatmul.msk.f32.vlgmr.msra.gmra.mxu3 %vm44_vm0, %v40_v3 }
   0x6   :  { %84 = vmatpush.msra.mxu0 %v42_v1  ;;  %180 = vmatpush.msra.mxu1 %v42_v1 }
   0x7   :  { %169 = vmatmul.msk.f32.vlgmr.msra.gmra.mxu0 %vm44_vm0, %v34_v4  ;;  %171 = vmatmul.msk.f32.vlgmr.msra.gmra.mxu1 %vm44_vm0, %v36_v5 }
   0xd   :  { %174 = vmatmul.msk.f32.gmra.mxu2 %vm44_vm0, %v39_v6  ;;  %176 = vmatmul.msk.f32.gmra.mxu3 %vm44_vm0, %v41_v7 }
   0xf   :  { %170 = vmatmul.msk.f32.gmra.mxu0 %vm44_vm0, %v35_v8  ;;  %172 = vmatmul.msk.f32.gmra.mxu1 %vm44_vm0, %v37_v9 }
  0x84   :  { %v86_v11 = vpop.f32.mrf.mxu0  ;;  %v92_v12 = vpop.f32.mrf.mxu1 }
  0x85   :  { %v141_v13 = vadd.f32 %v183_v10, %v86_v11  ;;  %v143_v14 = vadd.f32 %v183_v10, %v92_v12 }
  0x87   :  { %v149_v15 = vmax.f32 %v141_v13, 0.0  ;;  %v151_v16 = vmax.f32 %v143_v14, 0.0 }
  0x88   :  { %v98_v17 = vpop.f32.mrf.mxu2  ;;  %v104_v18 = vpop.f32.mrf.mxu3 }
  0x89   :  { %157 = vst [vmem:[%s272_s3] sm:$0xff] %v149_v15  ;;  %v145_v19 = vadd.f32 %v183_v10, %v98_v17  ;;  %v147_v20 = vadd.f32 %v183_v10, %v104_v18 }
  0x8a   :  { %159 = vst [vmem:[%s272_s3 + $0x10] sm:$0xff] %v151_v16 }
  0x8b   :  { %v153_v21 = vmax.f32 %v145_v19, 0.0  ;;  %v155_v22 = vmax.f32 %v147_v20, 0.0 }
  0x8c   :  { %v89_v23 = vpop.f32.mrf.mxu0  ;;  %v95_v24 = vpop.f32.mrf.mxu1 }
  0x8d   :  { %161 = vst [vmem:[%s272_s3 + $0x20] sm:$0xff] %v153_v21  ;;  %v142_v25 = vadd.f32 %v183_v10, %v89_v23  ;;  %v144_v26 = vadd.f32 %v183_v10, %v95_v24 }
  0x8e   :  { %163 = vst [vmem:[%s272_s3 + $0x30] sm:$0xff] %v155_v22 }
  0x8f   :  { %v150_v27 = vmax.f32 %v142_v25, 0.0  ;;  %v152_v28 = vmax.f32 %v144_v26, 0.0 }
  0x90   :  { %v101_v29 = vpop.f32.mrf.mxu2  ;;  %v107_v30 = vpop.f32.mrf.mxu3 }
  0x91   :  { %158 = vst [vmem:[%s272_s3 + $0x8] sm:$0xff] %v150_v27  ;;  %v146_v31 = vadd.f32 %v183_v10, %v101_v29  ;;  %v148_v32 = vadd.f32 %v183_v10, %v107_v30 }
  0x92   :  { %160 = vst [vmem:[%s272_s3 + $0x18] sm:$0xff] %v152_v28 }
  0x93   :  { %v154_v33 = vmax.f32 %v146_v31, 0.0  ;;  %v156_v34 = vmax.f32 %v148_v32, 0.0 }
  0x95   :  { %162 = vst [vmem:[%s272_s3 + $0x28] sm:$0xff] %v154_v33 }
  0x96   :  { %164 = vst [vmem:[%s272_s3 + $0x38] sm:$0xff] %v156_v34 }

// kernel: forward_pallas.11
= control target key start
LH: loop header
LB: loop body
LE: loop exit
PB: predicated region body
PF: predicated region fallthrough
CT: control target
= control target key end

     0   :  { %vm50_vm0 = vcmask 523264   ;;  %s303_s1 = inlined_call_operand.vmem [shape: f32[64,128], index: 1, kind: input, shape index: {}]   ;;  %s304_s2 = inlined_call_operand.vmem [shape: f32[1,128], index: 2, kind: input, shape index: {}]   ;;  %s305_s0 = inlined_call_operand.vmem [shape: f32[64,64], index: 0, kind: input, shape index: {}]   ;;  %s306_s3 = inlined_call_operand.vmem [shape: f32[64,128], index: 3, kind: output, shape index: {}]  }
   0x1   :  { %v49_v0 = vld [vmem:[%s303_s1 + $0x38] sm:$0xff]  ;;  %v48_v1 = vld [vmem:[%s303_s1 + $0x30] sm:$0xff]  ;;  %v47_v2 = vld [vmem:[%s303_s1 + $0x28] sm:$0xff] }
   0x2   :  { %176 = vmatpush.msra.mxu2 %v49_v0  ;;  %177 = vmatpush.msra.mxu3 %v49_v0  ;;  %v46_v3 = vld [vmem:[%s303_s1 + $0x20] sm:$0xff]  ;;  %v45_v4 = vld [vmem:[%s303_s1 + $0x18] sm:$0xff]  ;;  %v44_v5 = vld [vmem:[%s303_s1 + $0x10] sm:$0xff] }
   0x3   :  { %83 = vmatpush.msra.mxu0 %v49_v0  ;;  %175 = vmatpush.msra.mxu1 %v49_v0  ;;  %v43_v6 = vld [vmem:[%s303_s1 + $0x8] sm:$0xff]  ;;  %v42_v7 = vld [vmem:[%s303_s1] sm:$0xff]  ;;  %v40_v9 = vld [vmem:[%s305_s0 + $0x30] sm:$0xff] }
   0x4   :  { %179 = vmatpush.msra.mxu2 %v48_v1  ;;  %180 = vmatpush.msra.mxu3 %v48_v1  ;;  %v38_v8 = vld [vmem:[%s305_s0 + $0x20] sm:$0xff]  ;;  %v36_v11 = vld [vmem:[%s305_s0 + $0x10] sm:$0xff]  ;;  %v39_v12 = vld [vmem:[%s305_s0 + $0x28] sm:$0xff] }
   0x5   :  { %84 = vmatpush.msra.mxu0 %v48_v1  ;;  %178 = vmatpush.msra.mxu1 %v48_v1  ;;  %v34_v10 = vld [vmem:[%s305_s0] sm:$0xff]  ;;  %v41_v13 = vld [vmem:[%s305_s0 + $0x38] sm:$0xff]  ;;  %v35_v14 = vld [vmem:[%s305_s0 + $0x8] sm:$0xff] }
   0x6   :  { %182 = vmatpush.msra.mxu2 %v47_v2  ;;  %183 = vmatpush.msra.mxu3 %v47_v2  ;;  %v37_v15 = vld [vmem:[%s305_s0 + $0x18] sm:$0xff]  ;;  %v199_v16 = vld [vmem:[%s304_s2] ss:$0 sm:$0xff] }
   0x7   :  { %85 = vmatpush.msra.mxu0 %v47_v2  ;;  %181 = vmatpush.msra.mxu1 %v47_v2 }
   0x8   :  { %185 = vmatpush.msra.mxu2 %v46_v3  ;;  %186 = vmatpush.msra.mxu3 %v46_v3 }
   0x9   :  { %86 = vmatpush.msra.mxu0 %v46_v3  ;;  %184 = vmatpush.msra.mxu1 %v46_v3 }
   0xa   :  { %188 = vmatpush.msra.mxu2 %v45_v4  ;;  %189 = vmatpush.msra.mxu3 %v45_v4 }
   0xb   :  { %87 = vmatpush.msra.mxu0 %v45_v4  ;;  %187 = vmatpush.msra.mxu1 %v45_v4 }
   0xc   :  { %191 = vmatpush.msra.mxu2 %v44_v5  ;;  %192 = vmatpush.msra.mxu3 %v44_v5 }
   0xd   :  { %88 = vmatpush.msra.mxu0 %v44_v5  ;;  %190 = vmatpush.msra.mxu1 %v44_v5 }
   0xe   :  { %194 = vmatpush.msra.mxu2 %v43_v6  ;;  %195 = vmatpush.msra.mxu3 %v43_v6 }
   0xf   :  { %89 = vmatpush.msra.mxu0 %v43_v6  ;;  %193 = vmatpush.msra.mxu1 %v43_v6 }
  0x10   :  { %197 = vmatpush.msra.mxu2 %v42_v7  ;;  %198 = vmatpush.msra.mxu3 %v42_v7 }
  0x11   :  { %171 = vmatmul.msk.f32.vlgmr.msra.gmra.mxu2 %vm50_vm0, %v38_v8  ;;  %173 = vmatmul.msk.f32.vlgmr.msra.gmra.mxu3 %vm50_vm0, %v40_v9 }
  0x12   :  { %90 = vmatpush.msra.mxu0 %v42_v7  ;;  %196 = vmatpush.msra.mxu1 %v42_v7 }
  0x13   :  { %167 = vmatmul.msk.f32.vlgmr.msra.gmra.mxu0 %vm50_vm0, %v34_v10  ;;  %169 = vmatmul.msk.f32.vlgmr.msra.gmra.mxu1 %vm50_vm0, %v36_v11 }
  0x19   :  { %172 = vmatmul.msk.f32.gmra.mxu2 %vm50_vm0, %v39_v12  ;;  %174 = vmatmul.msk.f32.gmra.mxu3 %vm50_vm0, %v41_v13 }
  0x1b   :  { %168 = vmatmul.msk.f32.gmra.mxu0 %vm50_vm0, %v35_v14  ;;  %170 = vmatmul.msk.f32.gmra.mxu1 %vm50_vm0, %v37_v15 }
  0x90   :  { %v92_v17 = vpop.f32.mrf.mxu0  ;;  %v98_v18 = vpop.f32.mrf.mxu1 }
  0x91   :  { %v147_v19 = vadd.f32 %v199_v16, %v92_v17  ;;  %v149_v20 = vadd.f32 %v199_v16, %v98_v18 }
  0x93   :  { %155 = vst [vmem:[%s306_s3] sm:$0xff] %v147_v19 }
  0x94   :  { %157 = vst [vmem:[%s306_s3 + $0x10] sm:$0xff] %v149_v20  ;;  %v104_v21 = vpop.f32.mrf.mxu2  ;;  %v110_v22 = vpop.f32.mrf.mxu3 }
  0x95   :  { %v151_v23 = vadd.f32 %v199_v16, %v104_v21  ;;  %v153_v24 = vadd.f32 %v199_v16, %v110_v22 }
  0x97   :  { %159 = vst [vmem:[%s306_s3 + $0x20] sm:$0xff] %v151_v23 }
  0x98   :  { %161 = vst [vmem:[%s306_s3 + $0x30] sm:$0xff] %v153_v24  ;;  %v95_v25 = vpop.f32.mrf.mxu0  ;;  %v101_v26 = vpop.f32.mrf.mxu1 }
  0x99   :  { %v148_v27 = vadd.f32 %v199_v16, %v95_v25  ;;  %v150_v28 = vadd.f32 %v199_v16, %v101_v26 }
  0x9b   :  { %156 = vst [vmem:[%s306_s3 + $0x8] sm:$0xff] %v148_v27 }
  0x9c   :  { %158 = vst [vmem:[%s306_s3 + $0x18] sm:$0xff] %v150_v28  ;;  %v107_v29 = vpop.f32.mrf.mxu2  ;;  %v113_v30 = vpop.f32.mrf.mxu3 }
  0x9d   :  { %v152_v31 = vadd.f32 %v199_v16, %v107_v29  ;;  %v154_v32 = vadd.f32 %v199_v16, %v113_v30 }
  0x9f   :  { %160 = vst [vmem:[%s306_s3 + $0x28] sm:$0xff] %v152_v31 }
  0xa0   :  { %162 = vst [vmem:[%s306_s3 + $0x38] sm:$0xff] %v154_v32 }

// kernel: forward_pallas.14
= control target key start
LH: loop header
LB: loop body
LE: loop exit
PB: predicated region body
PF: predicated region fallthrough
CT: control target
= control target key end

     0   :  { %vm46_vm0 = vcmask 261120   ;;  %s283_s1 = inlined_call_operand.vmem [shape: f32[32,128], index: 1, kind: input, shape index: {}]   ;;  %s284_s0 = inlined_call_operand.vmem [shape: f32[64,32], index: 0, kind: input, shape index: {}]   ;;  %s285_s2 = inlined_call_operand.vmem [shape: f32[1,128], index: 2, kind: input, shape index: {}]   ;;  %s286_s3 = inlined_call_operand.vmem [shape: f32[64,128], index: 3, kind: output, shape index: {}]  }
   0x1   :  { %v45_v0 = vld [vmem:[%s283_s1 + $0x18] sm:$0xff]  ;;  %v44_v1 = vld [vmem:[%s283_s1 + $0x10] sm:$0xff]  ;;  %v43_v2 = vld [vmem:[%s283_s1 + $0x8] sm:$0xff] }
   0x2   :  { %180 = vmatpush.msra.mxu2 %v45_v0  ;;  %181 = vmatpush.msra.mxu3 %v45_v0  ;;  %v42_v3 = vld [vmem:[%s283_s1] sm:$0xff]  ;;  %v40_v5 = vld [vmem:[%s284_s0 + $0x30] sm:$0xff]  ;;  %v39_v8 = vld [vmem:[%s284_s0 + $0x28] sm:$0xff] }
   0x3   :  { %83 = vmatpush.msra.mxu0 %v45_v0  ;;  %179 = vmatpush.msra.mxu1 %v45_v0  ;;  %v38_v4 = vld [vmem:[%s284_s0 + $0x20] sm:$0xff]  ;;  %v36_v7 = vld [vmem:[%s284_s0 + $0x10] sm:$0xff]  ;;  %v41_v9 = vld [vmem:[%s284_s0 + $0x38] sm:$0xff] }
   0x4   :  { %183 = vmatpush.msra.mxu2 %v44_v1  ;;  %184 = vmatpush.msra.mxu3 %v44_v1  ;;  %v34_v6 = vld [vmem:[%s284_s0] sm:$0xff]  ;;  %v35_v10 = vld [vmem:[%s284_s0 + $0x8] sm:$0xff]  ;;  %v37_v11 = vld [vmem:[%s284_s0 + $0x18] sm:$0xff] }
   0x5   :  { %84 = vmatpush.msra.mxu0 %v44_v1  ;;  %182 = vmatpush.msra.mxu1 %v44_v1  ;;  %v191_v12 = vld [vmem:[%s285_s2] ss:$0 sm:$0xff] }
   0x6   :  { %186 = vmatpush.msra.mxu2 %v43_v2  ;;  %187 = vmatpush.msra.mxu3 %v43_v2 }
   0x7   :  { %85 = vmatpush.msra.mxu0 %v43_v2  ;;  %185 = vmatpush.msra.mxu1 %v43_v2 }
   0x8   :  { %189 = vmatpush.msra.mxu2 %v42_v3  ;;  %190 = vmatpush.msra.mxu3 %v42_v3 }
   0x9   :  { %175 = vmatmul.msk.f32.vlgmr.msra.gmra.mxu2 %vm46_vm0, %v38_v4  ;;  %177 = vmatmul.msk.f32.vlgmr.msra.gmra.mxu3 %vm46_vm0, %v40_v5 }
   0xa   :  { %86 = vmatpush.msra.mxu0 %v42_v3  ;;  %188 = vmatpush.msra.mxu1 %v42_v3 }
   0xb   :  { %171 = vmatmul.msk.f32.vlgmr.msra.gmra.mxu0 %vm46_vm0, %v34_v6  ;;  %173 = vmatmul.msk.f32.vlgmr.msra.gmra.mxu1 %vm46_vm0, %v36_v7 }
  0x11   :  { %176 = vmatmul.msk.f32.gmra.mxu2 %vm46_vm0, %v39_v8  ;;  %178 = vmatmul.msk.f32.gmra.mxu3 %vm46_vm0, %v41_v9 }
  0x13   :  { %172 = vmatmul.msk.f32.gmra.mxu0 %vm46_vm0, %v35_v10  ;;  %174 = vmatmul.msk.f32.gmra.mxu1 %vm46_vm0, %v37_v11 }
  0x88   :  { %v88_v13 = vpop.f32.mrf.mxu0  ;;  %v94_v14 = vpop.f32.mrf.mxu1 }
  0x89   :  { %v143_v15 = vadd.f32 %v191_v12, %v88_v13  ;;  %v145_v16 = vadd.f32 %v191_v12, %v94_v14 }
  0x8b   :  { %v151_v17 = vmax.f32 %v143_v15, 0.0  ;;  %v153_v18 = vmax.f32 %v145_v16, 0.0 }
  0x8c   :  { %v100_v19 = vpop.f32.mrf.mxu2  ;;  %v106_v20 = vpop.f32.mrf.mxu3 }
  0x8d   :  { %159 = vst [vmem:[%s286_s3] sm:$0xff] %v151_v17  ;;  %v147_v21 = vadd.f32 %v191_v12, %v100_v19  ;;  %v149_v22 = vadd.f32 %v191_v12, %v106_v20 }
  0x8e   :  { %161 = vst [vmem:[%s286_s3 + $0x10] sm:$0xff] %v153_v18 }
  0x8f   :  { %v155_v23 = vmax.f32 %v147_v21, 0.0  ;;  %v157_v24 = vmax.f32 %v149_v22, 0.0 }
  0x90   :  { %v91_v25 = vpop.f32.mrf.mxu0  ;;  %v97_v26 = vpop.f32.mrf.mxu1 }
  0x91   :  { %163 = vst [vmem:[%s286_s3 + $0x20] sm:$0xff] %v155_v23  ;;  %v144_v27 = vadd.f32 %v191_v12, %v91_v25  ;;  %v146_v28 = vadd.f32 %v191_v12, %v97_v26 }
  0x92   :  { %165 = vst [vmem:[%s286_s3 + $0x30] sm:$0xff] %v157_v24 }
  0x93   :  { %v152_v29 = vmax.f32 %v144_v27, 0.0  ;;  %v154_v30 = vmax.f32 %v146_v28, 0.0 }
  0x94   :  { %v103_v31 = vpop.f32.mrf.mxu2  ;;  %v109_v32 = vpop.f32.mrf.mxu3 }
  0x95   :  { %160 = vst [vmem:[%s286_s3 + $0x8] sm:$0xff] %v152_v29  ;;  %v148_v33 = vadd.f32 %v191_v12, %v103_v31  ;;  %v150_v34 = vadd.f32 %v191_v12, %v109_v32 }
  0x96   :  { %162 = vst [vmem:[%s286_s3 + $0x18] sm:$0xff] %v154_v30 }
  0x97   :  { %v156_v35 = vmax.f32 %v148_v33, 0.0  ;;  %v158_v36 = vmax.f32 %v150_v34, 0.0 }
  0x99   :  { %164 = vst [vmem:[%s286_s3 + $0x28] sm:$0xff] %v156_v35 }
  0x9a   :  { %166 = vst [vmem:[%s286_s3 + $0x38] sm:$0xff] %v158_v36 }

// kernel: forward_pallas.19
= control target key start
LH: loop header
LB: loop body
LE: loop exit
PB: predicated region body
PF: predicated region fallthrough
CT: control target
= control target key end

     0   :  { %vm29_vm0 = vcmask 523264   ;;  %s124_s1 = inlined_call_operand.vmem [shape: f32[64,128], index: 1, kind: input, shape index: {}]   ;;  %s125_s2 = inlined_call_operand.vmem [shape: f32[1,128], index: 2, kind: input, shape index: {}]   ;;  %s126_s0 = inlined_call_operand.vmem [shape: f32[8,64], index: 0, kind: input, shape index: {}]   ;;  %s127_s3 = inlined_call_operand.vmem [shape: f32[8,128], index: 3, kind: output, shape index: {}]  }
   0x1   :  { %v28_v0 = vld [vmem:[%s124_s1 + $0x38] sm:$0xff]  ;;  %v27_v1 = vld [vmem:[%s124_s1 + $0x30] sm:$0xff]  ;;  %v26_v2 = vld [vmem:[%s124_s1 + $0x28] sm:$0xff] }
   0x2   :  { %41 = vmatpush.msra.mxu0 %v28_v0  ;;  %v25_v3 = vld [vmem:[%s124_s1 + $0x20] sm:$0xff]  ;;  %v24_v4 = vld [vmem:[%s124_s1 + $0x18] sm:$0xff]  ;;  %v23_v5 = vld [vmem:[%s124_s1 + $0x10] sm:$0xff] }
   0x3   :  { %v22_v6 = vld [vmem:[%s124_s1 + $0x8] sm:$0xff]  ;;  %v21_v7 = vld [vmem:[%s124_s1] sm:$0xff] }
   0x4   :  { %42 = vmatpush.msra.mxu0 %v27_v1  ;;  %v20_v8 = vld [vmem:[%s126_s0] sm:$0xff] }
   0x5   :  { %v70_v9 = vld [vmem:[%s125_s2] ss:$0 sm:$0xff] }
   0x6   :  { %43 = vmatpush.msra.mxu0 %v26_v2 }
   0x8   :  { %44 = vmatpush.msra.mxu0 %v25_v3 }
   0xa   :  { %45 = vmatpush.msra.mxu0 %v24_v4 }
   0xc   :  { %46 = vmatpush.msra.mxu0 %v23_v5 }
   0xe   :  { %47 = vmatpush.msra.mxu0 %v22_v6 }
  0x10   :  { %48 = vmatpush.msra.mxu0 %v21_v7 }
  0x11   :  { %69 = vmatmul.msk.f32.vlgmr.msra.gmra.mxu0 %vm29_vm0, %v20_v8 }
  0x8e   :  { %v50_v10 = vpop.f32.mrf.mxu0 }
  0x8f   :  { %v63_v11 = vadd.f32 %v70_v9, %v50_v10 }
  0x91   :  { %64 = vst [vmem:[%s127_s3] sm:$0xff] %v63_v11 }

// kernel: forward_pallas.20
= control target key start
LH: loop header
LB: loop body
LE: loop exit
PB: predicated region body
PF: predicated region fallthrough
CT: control target
= control target key end

     0   :  { %vm25_vm0 = vcmask 261120   ;;  %s109_s1 = inlined_call_operand.vmem [shape: f32[32,128], index: 1, kind: input, shape index: {}]   ;;  %s110_s2 = inlined_call_operand.vmem [shape: f32[1,128], index: 2, kind: input, shape index: {}]   ;;  %s111_s0 = inlined_call_operand.vmem [shape: f32[8,32], index: 0, kind: input, shape index: {}]   ;;  %s112_s3 = inlined_call_operand.vmem [shape: f32[8,128], index: 3, kind: output, shape index: {}]  }
   0x1   :  { %v24_v0 = vld [vmem:[%s109_s1 + $0x18] sm:$0xff]  ;;  %v23_v1 = vld [vmem:[%s109_s1 + $0x10] sm:$0xff]  ;;  %v22_v2 = vld [vmem:[%s109_s1 + $0x8] sm:$0xff] }
   0x2   :  { %41 = vmatpush.msra.mxu0 %v24_v0  ;;  %v21_v3 = vld [vmem:[%s109_s1] sm:$0xff] }
   0x3   :  { %v20_v4 = vld [vmem:[%s111_s0] sm:$0xff] }
   0x4   :  { %42 = vmatpush.msra.mxu0 %v23_v1  ;;  %v67_v5 = vld [vmem:[%s110_s2] ss:$0 sm:$0xff] }
   0x6   :  { %43 = vmatpush.msra.mxu0 %v22_v2 }
   0x8   :  { %44 = vmatpush.msra.mxu0 %v21_v3 }
   0x9   :  { %66 = vmatmul.msk.f32.vlgmr.msra.gmra.mxu0 %vm25_vm0, %v20_v4 }
  0x86   :  { %v46_v6 = vpop.f32.mrf.mxu0 }
  0x87   :  { %v59_v7 = vadd.f32 %v67_v5, %v46_v6 }
  0x89   :  { %v60_v8 = vmax.f32 %v59_v7, 0.0 }
  0x8b   :  { %61 = vst [vmem:[%s112_s3] sm:$0xff] %v60_v8 }

// kernel: forward_pallas.21
= control target key start
LH: loop header
LB: loop body
LE: loop exit
PB: predicated region body
PF: predicated region fallthrough
CT: control target
= control target key end

     0   :  { %vm25_vm0 = vcmask 261120   ;;  %s108_s1 = inlined_call_operand.vmem [shape: f32[32,128], index: 1, kind: input, shape index: {}]   ;;  %s109_s2 = inlined_call_operand.vmem [shape: f32[1,128], index: 2, kind: input, shape index: {}]   ;;  %s110_s0 = inlined_call_operand.vmem [shape: f32[8,32], index: 0, kind: input, shape index: {}]   ;;  %s111_s3 = inlined_call_operand.vmem [shape: f32[8,128], index: 3, kind: output, shape index: {}]  }
   0x1   :  { %v24_v0 = vld [vmem:[%s108_s1 + $0x18] sm:$0xff]  ;;  %v23_v1 = vld [vmem:[%s108_s1 + $0x10] sm:$0xff]  ;;  %v22_v2 = vld [vmem:[%s108_s1 + $0x8] sm:$0xff] }
   0x2   :  { %41 = vmatpush.msra.mxu0 %v24_v0  ;;  %v21_v3 = vld [vmem:[%s108_s1] sm:$0xff] }
   0x3   :  { %v20_v4 = vld [vmem:[%s110_s0] sm:$0xff] }
   0x4   :  { %42 = vmatpush.msra.mxu0 %v23_v1  ;;  %v66_v5 = vld [vmem:[%s109_s2] ss:$0 sm:$0xff] }
   0x6   :  { %43 = vmatpush.msra.mxu0 %v22_v2 }
   0x8   :  { %44 = vmatpush.msra.mxu0 %v21_v3 }
   0x9   :  { %65 = vmatmul.msk.f32.vlgmr.msra.gmra.mxu0 %vm25_vm0, %v20_v4 }
  0x86   :  { %v46_v6 = vpop.f32.mrf.mxu0 }
  0x87   :  { %v59_v7 = vadd.f32 %v66_v5, %v46_v6 }
  0x89   :  { %60 = vst [vmem:[%s111_s3] sm:$0xff] %v59_v7 }

</bundles_post_ra>
